<compile_context>
chip_gen: v7x
topology: tpu7x:2x2x1
jax: 0.10.0
libtpu: 0.0.40
codegen_flags: <defaults>
</compile_context>

<pallas_src>
import functools

import jax
import jax.numpy as jnp
from jax import lax
from jax.experimental import pallas as pl

# contract the last axis of both operands:  (n,k) x (o,k) -> (n,o)  ==  a @ b.T
_DN_LAST = (((1,), (1,)), ((), ()))


def _round_up(x, m):
    return ((x + m - 1) // m) * m


def _graph_comb_kernel(xy_ref, w_ref, b_ref, o_ref, *, n_valid, n_pad, k):
    # h = tanh([x|y] @ blockdiag(Wx, Wy)^T) == [tanh(x@Wx^T) | tanh(y@Wy^T)]
    #   -> h1 in lanes 0..E-1, h2 in lanes E..2E-1 (already "concatenated").
    h = jnp.tanh(lax.dot_general(xy_ref[...], w_ref[0], _DN_LAST,
                                 preferred_element_type=jnp.float32))
    # z = concat(h1, h2) @ Wc^T + b   (Wc zero-padded to (k,k); padded output
    # lanes stay exactly zero because both the Wc rows and the bias are zero).
    z = (lax.dot_general(h, w_ref[1], _DN_LAST,
                         preferred_element_type=jnp.float32)
         + b_ref[...])
    # If sublane padding was added, zero the padded rows (bias broadcast would
    # otherwise pollute them and the global norm).  Compile-time branch.
    if n_pad > n_valid:
        row = lax.broadcasted_iota(jnp.int32, (n_pad, k), 0)
        z = jnp.where(row < n_valid, z, 0.0)
    # output / ||output||_F  ->  output * rsqrt(sum(output^2))
    o_ref[...] = (z * lax.rsqrt(jnp.sum(z * z))).astype(o_ref.dtype)


def pack_graph_comb_params(w_attx, w_atty, w_comb, b_comb):
    """One-time parameter packing (hoisted out of the per-call hot path).

    w_attx/w_atty: (E, E) torch-layout (out, in).  w_comb: (E, 2E).  b: (E,).
    Returns (w_stack (2,K,K), bias (1,K)) with K = round_up(2E, 128).
    """
    E = w_attx.shape[0]
    E2 = 2 * E
    K = _round_up(E2, 128)                       # lane-dense width
    w_att = jnp.zeros((K, K), jnp.float32)
    w_att = w_att.at[:E, :E].set(w_attx)         # block-diagonal attention weight
    w_att = w_att.at[E:E2, E:E2].set(w_atty)
    w_c = jnp.zeros((K, K), jnp.float32)
    w_c = w_c.at[:E, :E2].set(w_comb)            # original torch-layout comb weight
    w_stack = jnp.stack([w_att, w_c])            # (2, K, K) -> single DMA
    bias = jnp.zeros((1, K), jnp.float32).at[0, :E].set(b_comb)
    return w_stack, bias


@jax.jit
def graph_comb_packed(x, y, w_stack, bias):
    """x, y: (N, E) float32.  w_stack/bias from pack_graph_comb_params."""
    N, E = x.shape
    K = w_stack.shape[-1]
    N_pad = _round_up(N, 8)                      # sublane multiple

    # Pack activations: x in lanes [0, E), y in lanes [E, 2E), zeros elsewhere.
    xy = jnp.zeros((N_pad, K), jnp.float32)
    xy = xy.at[:N, :E].set(x).at[:N, E:2 * E].set(y)

    f32 = 4
    cost = pl.CostEstimate(
        flops=2 * 2 * N_pad * K * K,             # two (N_pad,K)x(K,K) dots
        transcendentals=N_pad * K + 1,           # tanh + rsqrt
        bytes_accessed=f32 * (N_pad * K          # xy
                              + 2 * K * K        # packed weights
                              + K                # bias
                              + N_pad * K),      # out
    )

    kernel = functools.partial(_graph_comb_kernel,
                               n_valid=N, n_pad=N_pad, k=K)

    out_pad = pl.pallas_call(
        kernel,
        out_shape=jax.ShapeDtypeStruct((N_pad, K), jnp.float32),
        in_specs=[pl.BlockSpec((N_pad, K), lambda: (0, 0)),
                  pl.BlockSpec((2, K, K), lambda: (0, 0, 0)),
                  pl.BlockSpec((1, K), lambda: (0, 0))],
        out_specs=pl.BlockSpec((N_pad, K), lambda: (0, 0)),
        cost_estimate=cost,
    )(xy, w_stack, bias)

    return out_pad[:N, :E]


def graph_comb_ref(x, y, w_attx, w_atty, w_comb, b_comb):
    h1 = jnp.tanh(x @ w_attx.T)
    h2 = jnp.tanh(y @ w_atty.T)
    out = jnp.concatenate([h1, h2], axis=1) @ w_comb.T + b_comb
    return out / jnp.linalg.norm(out)


if __name__ == "__main__":
    N, E = 8, 32   # batch of node embeddings, embed_dim
    key = jax.random.PRNGKey(0)
    kx, ky, k1, k2, k3, k4 = jax.random.split(key, 6)

    x = jax.random.normal(kx, (N, E), dtype=jnp.float32)
    y = jax.random.normal(ky, (N, E), dtype=jnp.float32)

    # Deterministic parameter init (shapes follow nn.Linear in __init__).
    w_attx = jax.random.normal(k1, (E, E), dtype=jnp.float32) * (1.0 / jnp.sqrt(E))
    w_atty = jax.random.normal(k2, (E, E), dtype=jnp.float32) * (1.0 / jnp.sqrt(E))
    w_comb = jax.random.normal(k3, (E, 2 * E), dtype=jnp.float32) * (1.0 / jnp.sqrt(2 * E))
    b_comb = jax.random.normal(k4, (E,), dtype=jnp.float32) * 0.01

    # One-time packing of parameters (outside the hot path).
    w_stack, bias = pack_graph_comb_params(w_attx, w_atty, w_comb, b_comb)
    w_stack, bias = jax.block_until_ready((w_stack, bias))

    out = graph_comb_packed(x, y, w_stack, bias)
    out = jax.block_until_ready(out)

    ref = graph_comb_ref(x, y, w_attx, w_atty, w_comb, b_comb)
    assert jnp.allclose(out, ref, atol=1e-5, rtol=1e-5), "mismatch vs reference"

    print("KERNEL_OK")
</pallas_src>

<mosaic_0001>
module attributes {stable_mosaic.version = 11 : i64} {
  func.func @_graph_comb_kernel(%arg0: memref<8x128xf32, #tpu.memory_space<vmem>>, %arg1: memref<2x128x128xf32, #tpu.memory_space<vmem>>, %arg2: memref<1x128xf32, #tpu.memory_space<vmem>>, %arg3: memref<8x128xf32, #tpu.memory_space<vmem>>) attributes {dimension_semantics = [], scalar_prefetch = 0 : i64, scratch_operands = 0 : i64, tpu.core_type = #tpu.core_type<tc>} {
    %c0 = arith.constant 0 : index
    %c0_0 = arith.constant 0 : index
    %0 = vector.load %arg0[%c0, %c0_0] : memref<8x128xf32, #tpu.memory_space<vmem>>, vector<8x128xf32>
    %c0_1 = arith.constant 0 : index
    %c0_2 = arith.constant 0 : index
    %c0_3 = arith.constant 0 : index
    %1 = vector.load %arg1[%c0_1, %c0_2, %c0_3] : memref<2x128x128xf32, #tpu.memory_space<vmem>>, vector<1x128x128xf32>
    %2 = vector.shape_cast %1 : vector<1x128x128xf32> to vector<128x128xf32>
    %cst = arith.constant dense<0.000000e+00> : vector<8x128xf32>
    %3 = tpu.matmul %0, %2, %cst {dimension_numbers = #tpu.dot_dimension_numbers<[1], [1], [0], [0], [0, 0, 1, 0], [], []>} : vector<8x128xf32>, vector<128x128xf32>, vector<8x128xf32> -> vector<8x128xf32>
    %4 = math.tanh %3 : vector<8x128xf32>
    %c1 = arith.constant 1 : index
    %c0_4 = arith.constant 0 : index
    %c0_5 = arith.constant 0 : index
    %5 = vector.load %arg1[%c1, %c0_4, %c0_5] : memref<2x128x128xf32, #tpu.memory_space<vmem>>, vector<1x128x128xf32>
    %6 = vector.shape_cast %5 : vector<1x128x128xf32> to vector<128x128xf32>
    %cst_6 = arith.constant dense<0.000000e+00> : vector<8x128xf32>
    %7 = tpu.matmul %4, %6, %cst_6 {dimension_numbers = #tpu.dot_dimension_numbers<[1], [1], [0], [0], [0, 0, 1, 0], [], []>} : vector<8x128xf32>, vector<128x128xf32>, vector<8x128xf32> -> vector<8x128xf32>
    %c0_7 = arith.constant 0 : index
    %c0_8 = arith.constant 0 : index
    %8 = vector.load %arg2[%c0_7, %c0_8] : memref<1x128xf32, #tpu.memory_space<vmem>>, vector<1x128xf32>
    %9 = vector.broadcast %8 : vector<1x128xf32> to vector<8x128xf32>
    %10 = arith.addf %7, %9 : vector<8x128xf32>
    %11 = arith.mulf %10, %10 : vector<8x128xf32>
    %12 = vector.shape_cast %11 : vector<8x128xf32> to vector<1x8x128xf32>
    %cst_9 = arith.constant dense<0.000000e+00> : vector<1xf32>
    %13 = vector.multi_reduction <add>, %12, %cst_9 [1, 2] : vector<1x8x128xf32> to vector<1xf32>
    %14 = vector.shape_cast %13 : vector<1xf32> to vector<1x1x1xf32>
    %15 = vector.extract %14[0, 0, 0] : f32 from vector<1x1x1xf32>
    %16 = math.rsqrt %15 : f32
    %17 = vector.broadcast %16 : f32 to vector<8x128xf32>
    %18 = arith.mulf %10, %17 : vector<8x128xf32>
    %c0_10 = arith.constant 0 : index
    %c0_11 = arith.constant 0 : index
    %19 = vector.load %arg3[%c0_10, %c0_11] : memref<8x128xf32, #tpu.memory_space<vmem>>, vector<8x128xf32>
    tpu.vector_store %arg3[%c0_10, %c0_11], %18 {strides = array<i32>} : memref<8x128xf32, #tpu.memory_space<vmem>>, vector<8x128xf32>,
    return
  }
}

</mosaic_0001>

<bundles_post_ra>
// kernel: graph_comb_packed.1
= control target key start
LH: loop header
LB: loop body
LE: loop exit
PB: predicated region body
PF: predicated region fallthrough
CT: control target
= control target key end

     0   :  { %8 = vsyncpa [#allocation3], 0  ;;  %s531_s0 = inlined_call_operand.vmem [shape: f32[8,128], index: 0, kind: input, shape index: {}]   ;;  %s532_s1 = inlined_call_operand.hbm [shape: f32[2,128,128], index: 1, kind: input, shape index: {}]   ;;  %s533_s2 = inlined_call_operand.vmem [shape: f32[1,128], index: 2, kind: input, shape index: {}]   ;;  %s534_s3 = inlined_call_operand.hbm [shape: f32[8,128], index: 3, kind: output, shape index: {}]  }
   0x1   :  { %9 = vsyncpa [#allocation4], 0  ;;  %s458_s12 = smov [#allocation2]   ;;  %s410_s16 = scalar_lea.hbm %s532_s1, 4096 }
   0x2   :  { %s17_s13 = sshll.u32 %s458_s12, 4  ;;  %p411_p0 = scmp.ne.s32.totalorder %s532_s1, %s410_s16  ;;  %s18_s13 = int_to_ptr.vmem [resolvable:$true] %s17_s13 }
   0x3   :  { %p414_p1 = scmp.lt.u32.totalorder %s410_s16, %s532_s1 }
   0x5   :  { %p416_p2 = pnand %p414_p1, %p411_p0 }
   0x7   :  { %419 = shalt.err (!%p416_p2)
}
   0x8   :  { %s420_s21 = scalar_lea.vmem %s18_s13, 4096  ;;  %p425_p4 = scmp.lt.s32.totalorder %s18_s13, %s18_s13 }
   0x9   :  { %p421_p3 = scmp.ne.s32.totalorder %s18_s13, %s420_s21  ;;  %p426_p5 = scmp.lt.s32.totalorder %s420_s21, %s420_s21 }
   0xb   :  { %p427_p6 = por %p426_p5, %p425_p4 }
   0xd   :  { %p428_p7 = pnand %p427_p6, %p421_p3 }
   0xf   :  { %431 = shalt.err (!%p428_p7)
}
  0x10   :  { %s459_s22 = smov 128   ;;  %s460_s23 = smov 8  }
  0x11   :  { %23 = dma.hbm_to_vmem [thread:$0]  %s532_s1, 4096, %s18_s13, [#allocation3], %s459_s22, %s459_s22, %s460_s23  }
  0x12   :  { %454 = dma.done.wait [#allocation3], 4096  }
  0x13   :  { %455 = vsyncadd [#allocation3], 4294963200  ;;  %v461_v0 = vmov 0.0|0.0   ;;  %vm462_vm0 = vmmov 0   ;;  %v463_v1 = vmov 0.0   ;;  %v30_v2 = vld [vmem:[#allocation2] sm:$0xff] }
  0x14   :  { %347 = vmatprep.subr.bf16.mxu0 %v461_v0  ;;  %309 = vmatprep.mubr.msk.f32.mxu0 %vm462_vm0, %v463_v1  ;;  %v31_v3 = vld [vmem:[#allocation2 + $0x8] sm:$0xff]  ;;  %v32_v5 = vld [vmem:[#allocation2 + $0x10] sm:$0xff]  ;;  %v33_v6 = vld [vmem:[#allocation2 + $0x18] sm:$0xff]  ;;  %s464_s29 = smov [#allocation5]  }
  0x15   :  { %371 = vmatprep.subr.bf16.mxu1 %v461_v0  ;;  %344 = vmatprep.mubr.msk.f32.mxu1 %vm462_vm0, %v463_v1  ;;  %v348_v4 = vpack.c.bf16 %v31_v3, %v30_v2  ;;  %v118_v7 = vld [vmem:[#allocation2 + $0x80] sm:$0xff]  ;;  %v119_v8 = vld [vmem:[#allocation2 + $0x88] sm:$0xff]  ;;  %v351_v9 = vpack.c.bf16 %v33_v6, %v32_v5  ;;  %v120_v11 = vld [vmem:[#allocation2 + $0x90] sm:$0xff] }
  0x16   :  { %v372_v10 = vpack.c.bf16 %v119_v8, %v118_v7  ;;  %v121_v12 = vld [vmem:[#allocation2 + $0x98] sm:$0xff]  ;;  %v34_v13 = vld [vmem:[#allocation2 + $0x20] sm:$0xff]  ;;  %v35_v14 = vld [vmem:[#allocation2 + $0x28] sm:$0xff] }
  0x17   :  { %349 = vmatpush3.bf16.xpose.msra.mxu0 %v348_v4  ;;  %v375_v15 = vpack.c.bf16 %v121_v12, %v120_v11  ;;  %v354_v16 = vpack.c.bf16 %v35_v14, %v34_v13  ;;  %v122_v17 = vld [vmem:[#allocation2 + $0xa0] sm:$0xff]  ;;  %v123_v18 = vld [vmem:[#allocation2 + $0xa8] sm:$0xff]  ;;  %v36_v19 = vld [vmem:[#allocation2 + $0x30] sm:$0xff] }
  0x18   :  { %350 = vmatprep.subr.bf16.mxu0 %v461_v0  ;;  %373 = vmatpush3.bf16.xpose.msra.mxu1 %v372_v10  ;;  %v37_v20 = vld [vmem:[#allocation2 + $0x38] sm:$0xff]  ;;  %v378_v21 = vpack.c.bf16 %v123_v18, %v122_v17  ;;  %v124_v23 = vld [vmem:[#allocation2 + $0xb0] sm:$0xff]  ;;  %v38_v25 = vld [vmem:[#allocation2 + $0x40] sm:$0xff] }
  0x19   :  { %374 = vmatprep.subr.bf16.mxu1 %v461_v0  ;;  %v357_v22 = vpack.c.bf16 %v37_v20, %v36_v19  ;;  %v125_v24 = vld [vmem:[#allocation2 + $0xb8] sm:$0xff]  ;;  %v39_v26 = vld [vmem:[#allocation2 + $0x48] sm:$0xff]  ;;  %v126_v29 = vld [vmem:[#allocation2 + $0xc0] sm:$0xff] }
  0x1a   :  { %v381_v27 = vpack.c.bf16 %v125_v24, %v124_v23  ;;  %v360_v28 = vpack.c.bf16 %v39_v26, %v38_v25  ;;  %v127_v30 = vld [vmem:[#allocation2 + $0xc8] sm:$0xff]  ;;  %v40_v31 = vld [vmem:[#allocation2 + $0x50] sm:$0xff]  ;;  %v41_v32 = vld [vmem:[#allocation2 + $0x58] sm:$0xff] }
  0x1b   :  { %v384_v33 = vpack.c.bf16 %v127_v30, %v126_v29  ;;  %v363_v34 = vpack.c.bf16 %v41_v32, %v40_v31  ;;  %v128_v35 = vld [vmem:[#allocation2 + $0xd0] sm:$0xff]  ;;  %v129_v36 = vld [vmem:[#allocation2 + $0xd8] sm:$0xff]  ;;  %v42_v37 = vld [vmem:[#allocation2 + $0x60] sm:$0xff] }
  0x1c   :  { %v43_v38 = vld [vmem:[#allocation2 + $0x68] sm:$0xff]  ;;  %v387_v39 = vpack.c.bf16 %v129_v36, %v128_v35  ;;  %v130_v41 = vld [vmem:[#allocation2 + $0xe0] sm:$0xff]  ;;  %v44_v43 = vld [vmem:[#allocation2 + $0x70] sm:$0xff] }
  0x1d   :  { %v366_v40 = vpack.c.bf16 %v43_v38, %v42_v37  ;;  %v131_v42 = vld [vmem:[#allocation2 + $0xe8] sm:$0xff]  ;;  %v45_v44 = vld [vmem:[#allocation2 + $0x78] sm:$0xff]  ;;  %v29_v47 = vld [vmem:[%s531_s0] sm:$0xff] }
  0x1e   :  { %v390_v45 = vpack.c.bf16 %v131_v42, %v130_v41  ;;  %v369_v46 = vpack.c.bf16 %v45_v44, %v44_v43  ;;  %v132_v48 = vld [vmem:[#allocation2 + $0xf0] sm:$0xff]  ;;  %v133_v49 = vld [vmem:[#allocation2 + $0xf8] sm:$0xff]  ;;  %v242_v54 = vld [vmem:[%s533_s2] ss:$0 sm:$0xff]  ;;  %s233_s2 = sshll.u32 %s464_s29, 4  ;;  %s234_s2 = int_to_ptr.vmem [resolvable:$true] %s233_s2 }
  0x1f   :  { %352 = vmatpush3.bf16.xpose.msra.mxu0 %v351_v9  ;;  %v393_v50 = vpack.c.bf16 %v133_v49, %v132_v48  ;;  %s432_s4 = scalar_lea.vmem %s234_s2, 128  ;;  %p437_p9 = scmp.lt.s32.totalorder %s234_s2, %s234_s2 }
  0x20   :  { %353 = vmatprep.subr.bf16.mxu0 %v461_v0  ;;  %376 = vmatpush3.bf16.xpose.msra.mxu1 %v375_v15  ;;  %p433_p8 = scmp.ne.s32.totalorder %s234_s2, %s432_s4  ;;  %p438_p10 = scmp.lt.s32.totalorder %s432_s4, %s432_s4 }
  0x21   :  { %377 = vmatprep.subr.bf16.mxu1 %v461_v0 }
  0x22   :  { %p439_p11 = por %p438_p10, %p437_p9 }
  0x24   :  { %p440_p12 = pnand %p439_p11, %p433_p8 }
  0x27   :  { %355 = vmatpush3.bf16.xpose.msra.mxu0 %v354_v16 }
  0x28   :  { %356 = vmatprep.subr.bf16.mxu0 %v461_v0  ;;  %379 = vmatpush3.bf16.xpose.msra.mxu1 %v378_v21 }
  0x29   :  { %380 = vmatprep.subr.bf16.mxu1 %v461_v0 }
  0x2f   :  { %358 = vmatpush3.bf16.xpose.msra.mxu0 %v357_v22 }
  0x30   :  { %359 = vmatprep.subr.bf16.mxu0 %v461_v0  ;;  %382 = vmatpush3.bf16.xpose.msra.mxu1 %v381_v27 }
  0x31   :  { %383 = vmatprep.subr.bf16.mxu1 %v461_v0 }
  0x37   :  { %361 = vmatpush3.bf16.xpose.msra.mxu0 %v360_v28 }
  0x38   :  { %362 = vmatprep.subr.bf16.mxu0 %v461_v0  ;;  %385 = vmatpush3.bf16.xpose.msra.mxu1 %v384_v33 }
  0x39   :  { %386 = vmatprep.subr.bf16.mxu1 %v461_v0 }
  0x3f   :  { %364 = vmatpush3.bf16.xpose.msra.mxu0 %v363_v34 }
  0x40   :  { %365 = vmatprep.subr.bf16.mxu0 %v461_v0  ;;  %388 = vmatpush3.bf16.xpose.msra.mxu1 %v387_v39 }
  0x41   :  { %389 = vmatprep.subr.bf16.mxu1 %v461_v0 }
  0x47   :  { %367 = vmatpush3.bf16.xpose.msra.mxu0 %v366_v40 }
  0x48   :  { %368 = vmatprep.subr.bf16.mxu0 %v461_v0  ;;  %391 = vmatpush3.bf16.xpose.msra.mxu1 %v390_v45 }
  0x49   :  { %392 = vmatprep.subr.bf16.mxu1 %v461_v0 }
  0x4f   :  { %370 = vmatpush3.bf16.xpose.msra.mxu0 %v369_v46 }
  0x50   :  { %394 = vmatpush3.bf16.xpose.msra.mxu1 %v393_v50 }
  0x56   :  { %310 = vmatmul.mubr.f32.vlgmr.msra.gmra.mrb[0].mxu0 %v29_v47 }
 0x129   :  { %v112_v51 = vpop.f32.mrb[0].mxu0 }
 0x12a   :  { %406 = vtanh.f32 %v112_v51  ;;  %v311_v52 = vpop.f32.mrb[1].mxu0 }
 0x134   :  { %v407_v53 = vpop.eup %406 }
 0x135   :  { %345 = vmatmul.mubr.f32.vlgmr.msra.gmra.mrb[0].mxu1 %v407_v53 }
 0x208   :  { %v207_v55 = vpop.f32.mrb[0].mxu1 }
 0x209   :  { %v208_v56 = vadd.f32 %v242_v54, %v207_v55  ;;  %v346_v57 = vpop.f32.mrb[1].mxu1 }
 0x20b   :  { %v211_v58 = vmul.f32 %v208_v56, %v208_v56 }
 0x20d   :  { %212 = vadd.xlane.f32.xlu0 %v211_v58 }
 0x29a   :  { %v213_v59 = vpop.xlane.xlu0 %212 }
 0x29b   :  { %v214_v60 = vrot.slane %v213_v59, 4 }
 0x29d   :  { %v215_v61 = vadd.f32 %v214_v60, %v213_v59 }
 0x29f   :  { %v216_v62 = vrot.slane %v215_v61, 2 }
 0x2a1   :  { %v217_v63 = vadd.f32 %v216_v62, %v215_v61 }
 0x2a3   :  { %v218_v0 = vrot.slane %v217_v63, 1 }
 0x2a5   :  { %v219_v1 = vadd.f32 %v218_v0, %v217_v63 }
 0x2a7   :  { %395 = vpush %v219_v1 }
 0x2d8   :  { %s396_s0 = spop %395 }
 0x2d9   :  { %v221_v2 = vstv %s396_s0 }
 0x2da   :  { %408 = vrsqrt.f32 %v221_v2 }
 0x2e4   :  { %v409_v3 = vpop.eup %408 }
 0x2e5   :  { %397 = vpush %v409_v3 }
 0x316   :  { %s398_s30 = spop %397 }
 0x317   :  { %v224_v4 = vstv %s398_s30 }
 0x318   :  { %v225_v5 = vmul.f32 %v224_v4, %v208_v56 }
 0x31a   :  { %226 = vst [vmem:[#allocation5] sm:$0xff] %v225_v5 }
 0x31b   :  { %443 = shalt.err (!%p440_p12)
}
 0x31c   :  { %s444_s7 = scalar_lea.hbm %s534_s3, 128 }
 0x31d   :  { %p445_p13 = scmp.ne.s32.totalorder %s534_s3, %s444_s7  ;;  %p448_p0 = scmp.lt.u32.totalorder %s444_s7, %s534_s3 }
 0x31f   :  { %p450_p1 = pnand %p448_p0, %p445_p13 }
 0x321   :  { %453 = shalt.err (!%p450_p1)
}
 0x322   :  { %236 = dma.vmem_to_hbm [thread:$0]  %s234_s2, 128, %s534_s3, [#allocation4]  }
 0x323   :  { %456 = dma.done.wait [#allocation4], 128  }
 0x324   :  { %457 = vsyncadd [#allocation4], 4294967168 }
 0x325   :  { %240 = vsyncpa [#allocation3], 1 }
 0x326   :  { %241 = vsyncpa [#allocation4], 1 }

</bundles_post_ra>
